<compile_context>
chip_gen: v7x
topology: tpu7x:2x2x1
jax: 0.10.0
libtpu: 0.0.40
codegen_flags: <defaults>
</compile_context>

<pallas_src>
import functools
import math

import jax
import jax.numpy as jnp
from jax import lax
from jax.experimental import pallas as pl
from jax.experimental.pallas import tpu as pltpu


def _pos_emb_phase_kernel(x_ref, out_ref, *, theta):
    """Generic path: one sin per element via cos(z) = sin(z + pi/2).

    x_ref: (tb, 1) f32 timesteps; out_ref: (tb, dim) embeddings.
    """
    _, dim = out_ref.shape
    half = dim // 2
    scale = -math.log(theta) / (half - 1)                       # static Python scalar

    col = lax.broadcasted_iota(jnp.int32, (1, dim), 1)          # lane index
    is_sin = col < half
    j = jnp.where(is_sin, col, col - half).astype(jnp.float32)
    freqs = jnp.exp(j * jnp.float32(scale))                     # (1, dim), EUP (tiny)
    phase = jnp.where(is_sin, jnp.float32(0.0), jnp.float32(math.pi / 2))
    arg = x_ref[...] * freqs + phase                            # (tb, dim) lane broadcast
    out_ref[...] = jnp.sin(arg).astype(out_ref.dtype)           # single EUP op / element


def _pos_emb_split_kernel(x_ref, out_ref, *, theta):
    """Lane-aligned path (half % 128 == 0): two unmasked stores, no iota/select."""
    _, dim = out_ref.shape
    half = dim // 2
    scale = -math.log(theta) / (half - 1)

    j = lax.broadcasted_iota(jnp.float32, (1, half), 1)
    freqs = jnp.exp(j * jnp.float32(scale))                     # (1, half)
    arg = x_ref[...] * freqs                                    # (tb, half)
    out_ref[:, :half] = jnp.sin(arg).astype(out_ref.dtype)
    out_ref[:, half:] = jnp.cos(arg).astype(out_ref.dtype)


def sinusoidal_pos_emb(x, dim, theta, *, tile_b=1024, out_dtype=jnp.float32):
    """x: (bs,) timesteps -> (bs, dim) embedding (matches torch SinusoidalPosEmb).

    tile_b: batch rows per grid step (multiple of 8).  Sized so the
            double-buffered output tile stays small on v7x's 64 MiB VMEM
            (2 * 1024 * dim * 4B = 4 MiB at dim=512).
    out_dtype: set to jnp.bfloat16 if the downstream consumer is bf16 to halve
            writeback bytes (compute stays f32 in-kernel).
    """
    assert dim % 2 == 0, "SinusoidalPosEmb kernel requires an even dim"
    assert dim >= 4, "dim must be >= 4 (dim==2 divides by zero, as in torch)"
    assert tile_b % 8 == 0

    half = dim // 2
    bs = x.shape[0]
    x2 = x.astype(jnp.float32).reshape(bs, 1)

    if bs <= tile_b:
        # Tiny batch: single full block, no grid overhead.
        tb = bs
        bs_p = bs
    else:
        # Pad batch to a tile multiple so every block is full and lane/sublane aligned.
        tb = tile_b
        pad = (-bs) % tb
        if pad:
            x2 = jnp.pad(x2, ((0, pad), (0, 0)))
        bs_p = bs + pad

    kernel = _pos_emb_split_kernel if half % 128 == 0 else _pos_emb_phase_kernel

    out = pl.pallas_call(
        functools.partial(kernel, theta=float(theta)),
        out_shape=jax.ShapeDtypeStruct((bs_p, dim), out_dtype),
        grid=(bs_p // tb,),
        in_specs=[pl.BlockSpec((tb, 1), lambda i: (i, 0))],
        out_specs=pl.BlockSpec((tb, dim), lambda i: (i, 0)),
        compiler_params=pltpu.CompilerParams(
            dimension_semantics=("parallel",)),              # v7x: shard rows over 2 TCs
        cost_estimate=pl.CostEstimate(
            flops=2 * bs_p * dim,
            transcendentals=bs_p * dim + dim,
            bytes_accessed=bs_p * dim * jnp.dtype(out_dtype).itemsize + bs_p * 4),
    )(x2)

    return out if bs_p == bs else out[:bs]


# ----------------------------------------------------------------------------
def _reference(x, dim, theta):
    """Pure-JAX mirror of the torch module."""
    half = dim // 2
    emb = math.log(theta) / (half - 1)
    freqs = jnp.exp(jnp.arange(half, dtype=jnp.float32) * -emb)
    arg = x.astype(jnp.float32)[:, None] * freqs[None, :]
    return jnp.concatenate([jnp.sin(arg), jnp.cos(arg)], axis=-1)


if __name__ == "__main__":
    key = jax.random.PRNGKey(0)
    theta = 10000.0

    # 1) Small case (phase-trick kernel, single block path).
    bs, dim = 8, 32
    x = jax.random.uniform(key, (bs,), jnp.float32, minval=0.0, maxval=100.0)
    out = jax.block_until_ready(sinusoidal_pos_emb(x, dim, theta))
    assert out.shape == (bs, dim)
    err = float(jnp.max(jnp.abs(out - _reference(x, dim, theta))))
    assert err < 2e-3, f"phase-kernel max abs err {err}"

    # 2) Lane-aligned case (half % 128 == 0 -> split kernel).
    bs2, dim2 = 16, 256
    x2 = jax.random.uniform(jax.random.PRNGKey(1), (bs2,), jnp.float32, 0.0, 100.0)
    out2 = jax.block_until_ready(sinusoidal_pos_emb(x2, dim2, theta))
    err2 = float(jnp.max(jnp.abs(out2 - _reference(x2, dim2, theta))))
    assert err2 < 2e-3, f"split-kernel max abs err {err2}"

    # 3) Gridded + padded batch path (bs not a multiple of tile_b).
    bs3, dim3 = 1203, 32
    x3 = jax.random.uniform(jax.random.PRNGKey(2), (bs3,), jnp.float32, 0.0, 100.0)
    out3 = jax.block_until_ready(sinusoidal_pos_emb(x3, dim3, theta, tile_b=512))
    assert out3.shape == (bs3, dim3)
    err3 = float(jnp.max(jnp.abs(out3 - _reference(x3, dim3, theta))))
    assert err3 < 2e-3, f"gridded-kernel max abs err {err3}"

    print("KERNEL_OK")
</pallas_src>

<mosaic_0001>
module attributes {stable_mosaic.version = 11 : i64} {
  func.func @_pos_emb_phase_kernel(%arg0: i32, %arg1: memref<8x1xf32, #tpu.memory_space<vmem>>, %arg2: memref<8x32xf32, #tpu.memory_space<vmem>>) attributes {dimension_semantics = [#tpu.dimension_semantics<parallel>], iteration_bounds = array<i64: 1>, scalar_prefetch = 0 : i64, scratch_operands = 0 : i64, tpu.core_type = #tpu.core_type<tc>, window_params = [{transform_indices = @transform_0, window_bounds = array<i64: 8, 1>}, {transform_indices = @transform_1, window_bounds = array<i64: 8, 32>}]} {
    %0 = tpu.iota {dimensions = array<i32: 1>} : vector<1x32xi32>
    %c16_i32 = arith.constant 16 : i32
    %1 = vector.broadcast %c16_i32 : i32 to vector<1x32xi32>
    %2 = arith.cmpi slt, %0, %1 : vector<1x32xi32>
    %c16_i32_0 = arith.constant 16 : i32
    %3 = vector.broadcast %c16_i32_0 : i32 to vector<1x32xi32>
    %4 = arith.subi %0, %3 : vector<1x32xi32>
    %5 = arith.select %2, %0, %4 : vector<1x32xi1>, vector<1x32xi32>
    %6 = arith.sitofp %5 : vector<1x32xi32> to vector<1x32xf32>
    %cst = arith.constant -0.614022672 : f32
    %7 = vector.broadcast %cst : f32 to vector<1x32xf32>
    %8 = arith.mulf %6, %7 : vector<1x32xf32>
    %9 = math.exp %8 : vector<1x32xf32>
    %cst_1 = arith.constant 0.000000e+00 : f32
    %cst_2 = arith.constant 1.57079637 : f32
    %10 = vector.broadcast %cst_1 : f32 to vector<1x32xf32>
    %11 = vector.broadcast %cst_2 : f32 to vector<1x32xf32>
    %12 = arith.select %2, %10, %11 : vector<1x32xi1>, vector<1x32xf32>
    %c0 = arith.constant 0 : index
    %c0_3 = arith.constant 0 : index
    %13 = vector.load %arg1[%c0, %c0_3] : memref<8x1xf32, #tpu.memory_space<vmem>>, vector<8x1xf32>
    %14 = vector.broadcast %13 : vector<8x1xf32> to vector<8x32xf32>
    %15 = vector.broadcast %9 : vector<1x32xf32> to vector<8x32xf32>
    %16 = arith.mulf %14, %15 : vector<8x32xf32>
    %17 = vector.broadcast %12 : vector<1x32xf32> to vector<8x32xf32>
    %18 = arith.addf %16, %17 : vector<8x32xf32>
    %19 = math.sin %18 : vector<8x32xf32>
    %c0_4 = arith.constant 0 : index
    %c0_5 = arith.constant 0 : index
    %20 = vector.load %arg2[%c0_4, %c0_5] : memref<8x32xf32, #tpu.memory_space<vmem>>, vector<8x32xf32>
    tpu.vector_store %arg2[%c0_4, %c0_5], %19 {strides = array<i32>} : memref<8x32xf32, #tpu.memory_space<vmem>>, vector<8x32xf32>,
    return
  }
  func.func @transform_0(%arg0: i32) -> (i32, i32) {
    %c0_i32 = arith.constant 0 : i32
    %c0_i32_0 = arith.constant 0 : i32
    return %arg0, %c0_i32 : i32, i32
  }
  func.func @transform_1(%arg0: i32) -> (i32, i32) {
    %c0_i32 = arith.constant 0 : i32
    %c0_i32_0 = arith.constant 0 : i32
    return %arg0, %c0_i32 : i32, i32
  }
}

</mosaic_0001>

<bundles_post_ra>
// kernel: tpu_custom_call.1
= control target key start
LH: loop header
LB: loop body
LE: loop exit
PB: predicated region body
PF: predicated region fallthrough
CT: control target
= control target key end

     0   :  { %v196_v1 = vmov 0   ;;  %s251_s0 = inlined_call_operand.vmem [shape: f32[8,1], index: 0, kind: input, shape index: {}]   ;;  %s252_s1 = inlined_call_operand.hbm [shape: f32[8,32], index: 1, kind: output, shape index: {}]  }
   0x1   :  { %v19_v0 = vld [vmem:[%s251_s0] sm:$0xff]  ;;  %165 = vset.pattern.permute.xlu0 %v196_v1 }
   0x2   :  { %6 = vsyncpa [#allocation3], 0  ;;  %22 = vperm.xlu0 %165, %v19_v0   ;;  %v9_v2 = vlaneseq  ;;  %v197_v11 = vmov 1.5707964   ;;  %v198_v26 = vmov 2102212464  }
   0x3   :  { %v199_v28 = vmov 920167782   ;;  %v200_v32 = vmov 1326507024   ;;  %v201_v34 = vmov 683565275  }
   0x4   :  { %v10_v3 = vand.u32 127, %v9_v2  ;;  %v202_v36 = vmov 2475754826   ;;  %v203_v39 = vmov 2131351028   ;;  %s204_s0 = smov [#allocation2]  }
   0x5   :  { %s139_s8 = sshll.u32 %s204_s0, 4  ;;  %vm131_vm13 = vcmask 261120   ;;  %s140_s8 = int_to_ptr.vmem [resolvable:$true] %s139_s8 }
   0x6   :  { %v147_v4 = vadd.s32 4294967280, %v10_v3  ;;  %vm11_vm0 = vcmp.lt.s32.totalorder %v10_v3, 16  ;;  %s172_s9 = scalar_lea.vmem %s140_s8, 128  ;;  %p177_p1 = scmp.lt.s32.totalorder %s140_s8, %s140_s8 }
   0x7   :  { %v18_v12 = vsel %vm11_vm0, 0.0, %v197_v11  ;;  %p173_p0 = scmp.ne.s32.totalorder %s140_s8, %s172_s9  ;;  %p178_p2 = scmp.lt.s32.totalorder %s172_s9, %s172_s9 }
   0x8   :  { %v13_v5 = vsel %vm11_vm0, %v10_v3, %v147_v4 }
   0x9   :  { %v14_v6 = vcvt.s32.f32 %v13_v5  ;;  %p179_p3 = por %p178_p2, %p177_p1 }
   0xb   :  { %v15_v7 = vmul.f32 -0.6140227, %v14_v6  ;;  %p180_p4 = pnand %p179_p3, %p173_p0 }
   0xd   :  { %v16_v8 = vmul.f32 1.442695, %v15_v7 }
   0xf   :  { %166 = vpow2.f32 %v16_v8 }
  0x19   :  { %v167_v9 = vpop.eup %166 }
  0x81   :  { %v23_v10 = vpop.permute.xlu0 %22 }
  0x82   :  { %v25_v13 = vmul.f32 %v167_v9, %v23_v10 }
  0x84   :  { %v218_v14 = vadd.f32 %v25_v13, %v18_v12 }
  0x86   :  { %v30_v15 = vand.u32 2139095040, %v218_v14  ;;  %v27_v16 = vand.u32 2147483647, %v218_v14  ;;  %vm29_vm8 = vcmp.lt.s32.totalorder %v218_v14, 0  ;;  %vm119_vm14 = vweird.f32 %v218_v14 }
  0x88   :  { %v31_v17 = vshrl.u32 %v30_v15, 23  ;;  %v34_v19 = vand.u32 8388607, %v27_v16  ;;  %vm28_vm9 = vcmp.le.f32.partialorder %v27_v16, 0.7853982 }
  0x8a   :  { %v148_v18 = vadd.s32 4294967169, %v31_v17  ;;  %v35_v22 = vor.u32 8388608, %v34_v19 }
  0x8c   :  { %v37_v20 = vadd.s32 1, %v148_v18  ;;  %v75_v30 = vshll.u32 %v35_v22, 8 }
  0x8e   :  { %vm38_vm1 = vcmp.gt.s32.totalorder %v37_v20, 0 }
  0x8f   :  { %v39_v21 = vsel %vm38_vm1, %v37_v20, 0 }
  0x90   :  { %v41_v23 = vand.u32 31, %v39_v21  ;;  %v40_v24 = vshrl.u32 %v39_v21, 5 }
  0x92   :  { %v42_v25 = vsub.s32 32, %v41_v23  ;;  %v53_v27 = vshll.u32 %v198_v26, %v41_v23  ;;  %v56_v29 = vshll.u32 %v199_v28, %v41_v23  ;;  %v44_v35 = vshll.u32 %v201_v34, %v41_v23 }
  0x93   :  { %v47_v38 = vshll.u32 %v202_v36, %v41_v23  ;;  %v50_v41 = vshll.u32 %v203_v39, %v41_v23  ;;  %vm62_vm2 = vcmp.lt.s32.totalorder %v40_v24, 4  ;;  %vm59_vm3 = vcmp.lt.s32.totalorder %v40_v24, 1 }
  0x94   :  { %v54_v31 = vshrl.u32 %v199_v28, %v42_v25  ;;  %v57_v33 = vshrl.u32 %v200_v32, %v42_v25  ;;  %v45_v37 = vshrl.u32 %v202_v36, %v42_v25  ;;  %v48_v40 = vshrl.u32 %v203_v39, %v42_v25 }
  0x95   :  { %v51_v42 = vshrl.u32 %v198_v26, %v42_v25  ;;  %v43_v46 = vshrl.u32 %v201_v34, %v42_v25  ;;  %vm60_vm4 = vcmp.lt.s32.totalorder %v40_v24, 2  ;;  %vm61_vm5 = vcmp.lt.s32.totalorder %v40_v24, 3 }
  0x96   :  { %v55_v43 = vor.u32 %v54_v31, %v53_v27  ;;  %v58_v44 = vor.u32 %v57_v33, %v56_v29  ;;  %v46_v45 = vor.u32 %v45_v37, %v44_v35  ;;  %v49_v47 = vor.u32 %v48_v40, %v47_v38 }
  0x97   :  { %v52_v48 = vor.u32 %v51_v42, %v50_v41 }
  0x98   :  { %v68_v49 = vsel %vm62_vm2, %v55_v43, 920167782  ;;  %v72_v50 = vsel %vm62_vm2, %v58_v44, 1326507024  ;;  %v67_v52 = vsel %vm59_vm3, %v46_v45, %v49_v47  ;;  %v63_v55 = vsel %vm59_vm3, %v43_v46, %v46_v45 }
  0x99   :  { %v64_v51 = vsel %vm62_vm2, %v52_v48, 2102212464  ;;  %v69_v53 = vsel %vm61_vm5, %v52_v48, %v68_v49  ;;  %v71_v54 = vsel %vm59_vm3, %v49_v47, %v52_v48  ;;  %v73_v58 = vsel %vm61_vm5, %v55_v43, %v72_v50 }
  0x9a   :  { %v65_v56 = vsel %vm61_vm5, %v49_v47, %v64_v51  ;;  %v70_v57 = vsel %vm60_vm4, %v67_v52, %v69_v53  ;;  %v74_v59 = vsel %vm60_vm4, %v71_v54, %v73_v58 }
  0x9b   :  { %v224_v60 = vmul.u32.u64.low %v75_v30, %v70_v57  ;;  %v225_v61 = vmul.u32.u64.high %v75_v30, %v70_v57, %v224_v60  ;;  %v227_v62 = vmul.u32.u64.low %v75_v30, %v74_v59  ;;  %v228_v63 = vmul.u32.u64.high %v75_v30, %v74_v59, %v227_v62 }
  0x9c   :  { %v66_v0 = vsel %vm60_vm4, %v63_v55, %v65_v56 }
  0x9d   :  { %v85_v1 = vadd.s32 1, %v225_v61  ;;  %v82_v2 = vmul.u32 %v75_v30, %v66_v0  ;;  %vm84_vm6 = vc.u32 %v228_v63, %v224_v60  ;;  %v83_v15 = vadd.s32 %v224_v60, %v228_v63 }
  0x9f   :  { %v86_v3 = vsel %vm84_vm6, %v85_v1, %v225_v61 }
  0xa0   :  { %v87_v4 = vadd.s32 %v86_v3, %v82_v2 }
  0xa2   :  { %v88_v5 = vadd.s32 536870912, %v87_v4 }
  0xa4   :  { %v89_v6 = vshrl.u32 %v88_v5, 30 }
  0xa6   :  { %v90_v7 = vshll.u32 %v89_v6, 30  ;;  %v113_v28 = vsub.s32 4, %v89_v6 }
  0xa8   :  { %v91_v8 = vsub.s32 %v87_v4, %v90_v7  ;;  %v114_v31 = vsel %vm29_vm8, %v113_v28, %v89_v6 }
  0xa9   :  { %v116_v33 = vsel %vm28_vm9, 0, %v114_v31 }
  0xaa   :  { %v93_v9 = vsub.s32 0, %v91_v8  ;;  %v120_v34 = vadd.s32 3, %v116_v33 }
  0xac   :  { %v149_v10 = vmin.u32 %v93_v9, %v91_v8  ;;  %v121_v35 = vand.u32 3, %v120_v34 }
  0xae   :  { %v95_v11 = vclz %v149_v10  ;;  %vm126_vm10 = vcmp.eq.s32.totalorder %v121_v35, 2  ;;  %vm123_vm11 = vcmp.eq.s32.totalorder %v121_v35, 0  ;;  %vm122_vm12 = vcmp.lt.s32.totalorder %v121_v35, 2 }
  0xb0   :  { %v150_v12 = vadd.s32 4294967294, %v95_v11 }
  0xb2   :  { %vm151_vm7 = vcmp.lt.s32.totalorder %v150_v12, 0 }
  0xb3   :  { %v98_v13 = vsel %vm151_vm7, 0, %v150_v12 }
  0xb4   :  { %v99_v17 = vsub.s32 32, %v98_v13  ;;  %v103_v18 = vsub.s32 4294967266, %v98_v13  ;;  %v100_v19 = vshll.u32 %v91_v8, %v98_v13 }
  0xb6   :  { %v101_v20 = vshrl.u32 %v83_v15, %v99_v17  ;;  %v104_v21 = vadd.s32 127, %v103_v18 }
  0xb8   :  { %v102_v22 = vor.u32 %v101_v20, %v100_v19  ;;  %v105_v23 = vshll.u32 %v104_v21, 23 }
  0xba   :  { %v106_v24 = vor.u32 4788187, %v105_v23  ;;  %v109_v26 = vcvt.s32.f32 %v102_v22 }
  0xbc   :  { %v107_v25 = vand.u32 2147483647, %v106_v24 }
  0xbe   :  { %v110_v27 = vmul.f32 %v109_v26, %v107_v25 }
  0xc0   :  { %v111_v29 = vxor.u32 2147483648, %v110_v27 }
  0xc2   :  { %v112_v30 = vsel %vm29_vm8, %v111_v29, %v110_v27 }
  0xc3   :  { %v115_v32 = vsel %vm28_vm9, %v218_v14, %v112_v30 }
  0xc4   :  { %168 = vcosq.f32 %v115_v32 }
  0xc5   :  { %170 = vsinq.f32 %v115_v32 }
  0xce   :  { %v169_v36 = vpop.eup %168 }
  0xcf   :  { %v171_v37 = vpop.eup %170  ;;  %v127_v38 = vxor.u32 2147483648, %v169_v36 }
  0xd0   :  { %v124_v39 = vxor.u32 2147483648, %v171_v37 }
  0xd1   :  { %v128_v40 = vsel %vm126_vm10, %v127_v38, %v171_v37 }
  0xd2   :  { %v125_v16 = vsel %vm123_vm11, %v169_v36, %v124_v39 }
  0xd3   :  { %v129_v41 = vsel %vm122_vm12, %v125_v16, %v128_v40 }
  0xd4   :  { %v130_v42 = vsel %vm119_vm14, nan, %v129_v41 }
  0xd5   :  { %132 = vst.msk [vmem:[#allocation2] sm:$0xff] %vm131_vm13, %v130_v42 }
  0xd6   :  { %183 = shalt.err (!%p180_p4)
}
  0xd7   :  { %s184_s12 = scalar_lea.hbm %s252_s1, 128 }
  0xd8   :  { %p185_p5 = scmp.ne.s32.totalorder %s252_s1, %s184_s12  ;;  %p188_p6 = scmp.lt.u32.totalorder %s184_s12, %s252_s1 }
  0xda   :  { %p190_p7 = pnand %p188_p6, %p185_p5 }
  0xdc   :  { %193 = shalt.err (!%p190_p7)
}
  0xdd   :  { %142 = dma.vmem_to_hbm [thread:$0]  %s140_s8, 128, %s252_s1, [#allocation3]  }
  0xde   :  { %194 = dma.done.wait [#allocation3], 128  }
  0xdf   :  { %195 = vsyncadd [#allocation3], 4294967168 }
  0xe0   :  { %146 = vsyncpa [#allocation3], 1 }

</bundles_post_ra>
